<compile_context>
chip_gen: v7x
topology: tpu7x:2x2x1
jax: 0.10.0
libtpu: 0.0.40
codegen_flags: <defaults>
</compile_context>

<pallas_src>
import functools
import inspect

import jax
import jax.numpy as jnp
from jax import lax
from jax.experimental import pallas as pl
from jax.experimental.pallas import tpu as pltpu

LN_EPS = 1e-5  # torch.nn.LayerNorm default


def _round_up(x, m):
    return ((x + m - 1) // m) * m


def _layer_norm(x, gamma, beta):
    # Two-pass (x - mean) variance: matches torch.nn.LayerNorm numerics (no E[x^2]-E[x]^2
    # cancellation) at the cost of one extra pass over the small (tm, d_model) tile.
    mean = jnp.mean(x, axis=-1, keepdims=True)
    xm = x - mean
    var = jnp.mean(xm * xm, axis=-1, keepdims=True)
    return xm * lax.rsqrt(var + LN_EPS) * gamma + beta


def _supports_pipeline_mode():
    """Feature check (not a blanket try/except around the build) for BlockSpec pipeline_mode."""
    if not hasattr(pl, "Buffered"):
        return False
    try:
        return "pipeline_mode" in inspect.signature(pl.BlockSpec).parameters
    except (TypeError, ValueError):
        return True


def _vmem_capacity_bytes():
    """Best-effort per-core VMEM capacity query; conservative (v7x-sized) fallback."""
    if hasattr(pltpu, "get_tpu_info"):
        try:
            cap = getattr(pltpu.get_tpu_info(), "vmem_capacity_bytes", None)
            if cap:
                return int(cap)
        except Exception:  # hardware probe only; fallback can never affect results
            pass
    return 64 << 20


def _select_epilogue_dtype(w_dtype):
    """bf16 elementwise epilogue on chips with a bf16 VPU (v6e/v7x); f32 otherwise."""
    if jnp.dtype(w_dtype) != jnp.dtype(jnp.bfloat16):
        return jnp.float32
    kind = ""
    devs = jax.devices()
    if devs:
        kind = getattr(devs[0], "device_kind", "").lower()
    if any(v in kind for v in ("v2", "v3", "v4", "v5")):
        return jnp.float32  # v5e and older have no bf16 VALU
    return jnp.bfloat16


# --------------------------------------------------------------------------------------
# Kernels
# --------------------------------------------------------------------------------------
def _ffn_resident_kernel(x_ref, w1_ref, b1_ref, w2_ref, b2_ref, g_ref, bt_ref,
                         o_ref, *, pre_lnorm, chunk, epilogue_dtype):
    """One (tm, d_model) row-tile; W1/W2 fully resident in VMEM.

    d_inner is processed in `chunk`-wide column blocks of W1 / row blocks of W2 so the
    bias/ReLU^2 epilogue of one chunk overlaps with the MXU pushes of its neighbours and
    the float32 intermediate is only (tm, chunk).
    """
    x = x_ref[...].astype(jnp.float32)
    gamma = g_ref[...].astype(jnp.float32)
    beta = bt_ref[...].astype(jnp.float32)

    inp = _layer_norm(x, gamma, beta) if pre_lnorm else x
    lhs = inp.astype(w1_ref.dtype)            # cast once; feeds every chunk's matmul-1

    d_inner = w1_ref.shape[1]
    n_chunks = d_inner // chunk

    def one_chunk(k0):
        h = jnp.dot(lhs, w1_ref[:, k0:k0 + chunk],
                    preferred_element_type=jnp.float32)
        h = h.astype(epilogue_dtype) + b1_ref[:, k0:k0 + chunk].astype(epilogue_dtype)
        h = jnp.maximum(h, 0.0)
        h = h * h                              # squared ReLU (Primer-EZ)
        return jnp.dot(h.astype(w2_ref.dtype), w2_ref[k0:k0 + chunk, :],
                       preferred_element_type=jnp.float32)

    # Static per-chunk slices (most robust Mosaic lowering); the accumulation chain keeps
    # each chunk's intermediates dead after it is consumed.
    y = one_chunk(0)
    for c in range(1, n_chunks):
        y = y + one_chunk(c * chunk)

    y = y + b2_ref[...].astype(jnp.float32)
    out = y + inp            # NB: residual adds to the *normalized* inp when pre_lnorm=True
    if not pre_lnorm:
        out = _layer_norm(out, gamma, beta)
    o_ref[...] = out.astype(o_ref.dtype)


def _ffn_dinner_tiled_kernel(x_ref, w1_ref, b1_ref, w2_ref, b2_ref, g_ref, bt_ref,
                             o_ref, acc_ref, *, pre_lnorm, epilogue_dtype):
    """d_inner streamed over the last ("arbitrary") grid axis; f32 accumulator scratch."""
    k = pl.program_id(1)

    @pl.when(k == 0)
    def _():
        acc_ref[...] = jnp.zeros_like(acc_ref)

    x = x_ref[...].astype(jnp.float32)
    gamma = g_ref[...].astype(jnp.float32)
    beta = bt_ref[...].astype(jnp.float32)
    inp = _layer_norm(x, gamma, beta) if pre_lnorm else x

    h = jnp.dot(inp.astype(w1_ref.dtype), w1_ref[...],
                preferred_element_type=jnp.float32)
    h = h.astype(epilogue_dtype) + b1_ref[...].astype(epilogue_dtype)
    h = jnp.maximum(h, 0.0)
    h = h * h                                  # squared ReLU (Primer-EZ)
    acc_ref[...] += jnp.dot(h.astype(w2_ref.dtype), w2_ref[...],
                            preferred_element_type=jnp.float32)

    @pl.when(k == pl.num_programs(1) - 1)
    def _():
        out = acc_ref[...] + b2_ref[...].astype(jnp.float32) + inp
        if not pre_lnorm:
            out = _layer_norm(out, gamma, beta)
        o_ref[...] = out.astype(o_ref.dtype)


# --------------------------------------------------------------------------------------
# Wrapper
# --------------------------------------------------------------------------------------
def positionwise_ff_primer_ez(inp, params, *, pre_lnorm: bool = False, tm: int = 512,
                              d_inner_chunk: int = 512, dinner_tile=None,
                              force_dinner_tiled: bool = False):
    """inp: (seq_len, batch, d_model) -> (seq_len, batch, d_model). Eval-mode forward.
    Activations keep the caller's dtype (pass bf16 to halve per-step DMA if the model is bf16).
    """
    seq_len, batch, d_model = inp.shape
    d_inner = params["w1"].shape[1]
    w_dtype = params["w1"].dtype
    n_rows = seq_len * batch

    # Row tiling: keep blocks (8, *)-aligned; only pad the ragged tail tile.
    tm_eff = min(tm, _round_up(n_rows, 8))
    n_pad = _round_up(n_rows, tm_eff)
    x2d = inp.reshape(n_rows, d_model)
    if n_pad != n_rows:
        # Zero rows are harmless (LayerNorm of zeros is finite) and sliced off below.
        x2d = jnp.pad(x2d, ((0, n_pad - n_rows), (0, 0)))
    n_row_tiles = n_pad // tm_eff

    epilogue_dtype = _select_epilogue_dtype(w_dtype)
    x_b = jnp.dtype(inp.dtype).itemsize
    w_b = jnp.dtype(w_dtype).itemsize
    e_b = jnp.dtype(epilogue_dtype).itemsize

    budget = int(0.875 * _vmem_capacity_bytes())      # generation-aware cap (~87.5%)
    single_buf = _supports_pipeline_mode()
    nw = 1 if single_buf else 2                       # weight buffering in resident path

    # d_inner chunk for the resident path (must divide d_inner; lane-aligned candidates).
    chunk = d_inner
    for c in (d_inner_chunk, 1024, 512, 256, 128):
        if c and c <= d_inner and d_inner % c == 0:
            chunk = c
            break

    resident_need = (
        2 * 2 * tm_eff * d_model * x_b                # x / out row tiles (double-buffered)
        + nw * 2 * d_model * d_inner * w_b            # resident W1 + W2
        + nw * (d_inner + 3 * d_model) * 4            # biases + LN params
        + tm_eff * d_model * (3 * 4 + w_b)            # f32 inp/acc/out temps + MXU-dtype lhs
        + tm_eff * chunk * (4 + e_b + w_b))           # per-chunk h in f32/epilogue/MXU dtype
    resident_limit = int(1.25 * resident_need) + (4 << 20)
    use_resident = (not force_dinner_tiled) and resident_limit <= budget

    cost = pl.CostEstimate(
        flops=4 * n_pad * d_model * d_inner,          # two matmuls
        transcendentals=2 * n_pad,                    # rsqrt per row (LN)
        bytes_accessed=2 * n_pad * d_model * x_b + 2 * d_model * d_inner * w_b)

    args = (x2d, params["w1"], params["b1"], params["w2"], params["b2"],
            params["ln_g"], params["ln_b"])
    out_shape = jax.ShapeDtypeStruct((n_pad, d_model), inp.dtype)

    if use_resident:
        def const_spec(shape):
            # Blocks whose index map never changes stay resident across the grid;
            # single-buffer them so VMEM holds exactly one copy of each weight matrix.
            if single_buf:
                return pl.BlockSpec(shape, lambda i: (0, 0),
                                    pipeline_mode=pl.Buffered(1))
            return pl.BlockSpec(shape, lambda i: (0, 0))

        kernel = functools.partial(_ffn_resident_kernel, pre_lnorm=pre_lnorm,
                                   chunk=chunk, epilogue_dtype=epilogue_dtype)
        out2d = pl.pallas_call(
            kernel,
            out_shape=out_shape,
            grid_spec=pltpu.PrefetchScalarGridSpec(
                num_scalar_prefetch=0,
                grid=(n_row_tiles,),
                in_specs=[
                    pl.BlockSpec((tm_eff, d_model), lambda i: (i, 0)),  # x row tile
                    const_spec((d_model, d_inner)),                     # W1 (resident)
                    const_spec((1, d_inner)),                           # b1
                    const_spec((d_inner, d_model)),                     # W2 (resident)
                    const_spec((1, d_model)),                           # b2
                    const_spec((1, d_model)),                           # ln gamma
                    const_spec((1, d_model)),                           # ln beta
                ],
                out_specs=pl.BlockSpec((tm_eff, d_model), lambda i: (i, 0)),
            ),
            compiler_params=pltpu.CompilerParams(
                dimension_semantics=("parallel",),
                vmem_limit_bytes=max(32 << 20, min(resident_limit, budget))),
            cost_estimate=cost,
        )(*args)
    else:
        # d_inner-tiled reduction path: stream W1 columns / W2 rows, accumulate in f32.
        def tiled_need(tk):
            return (2 * 2 * tm_eff * d_model * x_b            # x / out row tiles
                    + 2 * 2 * d_model * tk * w_b              # W1 / W2 k-tiles (double-buffered)
                    + 2 * tk * 4 + 2 * 3 * d_model * 4        # b1 k-tile + b2 / LN params
                    + 2 * tm_eff * d_model * 4                # f32 acc scratch + inp temp
                    + tm_eff * tk * (4 + e_b + w_b))          # per-tile h

        cands = [dinner_tile] if dinner_tile else [2048, 1024, 512, 256, 128]
        cands = [c for c in cands if c and c <= d_inner and d_inner % c == 0]
        if not cands:
            # TODO(synk): d_inner not a multiple of 128 *and* too large for VMEM would need
            # padded/ragged K tiles; not expected for transformer FFN sizes.
            cands = [d_inner]
        tk = cands[-1]
        for c in cands:
            if int(1.25 * tiled_need(c)) + (4 << 20) <= budget:
                tk = c
                break
        tiled_limit = int(1.25 * tiled_need(tk)) + (4 << 20)

        kernel = functools.partial(_ffn_dinner_tiled_kernel, pre_lnorm=pre_lnorm,
                                   epilogue_dtype=epilogue_dtype)
        out2d = pl.pallas_call(
            kernel,
            out_shape=out_shape,
            grid_spec=pltpu.PrefetchScalarGridSpec(
                num_scalar_prefetch=0,
                grid=(n_row_tiles, d_inner // tk),            # reduction axis last
                in_specs=[
                    pl.BlockSpec((tm_eff, d_model), lambda i, k: (i, 0)),  # x row tile
                    pl.BlockSpec((d_model, tk), lambda i, k: (0, k)),      # W1 k-tile
                    pl.BlockSpec((1, tk), lambda i, k: (0, k)),            # b1 k-tile
                    pl.BlockSpec((tk, d_model), lambda i, k: (k, 0)),      # W2 k-tile
                    pl.BlockSpec((1, d_model), lambda i, k: (0, 0)),       # b2
                    pl.BlockSpec((1, d_model), lambda i, k: (0, 0)),       # ln gamma
                    pl.BlockSpec((1, d_model), lambda i, k: (0, 0)),       # ln beta
                ],
                out_specs=pl.BlockSpec((tm_eff, d_model), lambda i, k: (i, 0)),
                scratch_shapes=[pltpu.VMEM((tm_eff, d_model), jnp.float32)],
            ),
            compiler_params=pltpu.CompilerParams(
                dimension_semantics=("parallel", "arbitrary"),
                vmem_limit_bytes=max(32 << 20, min(tiled_limit, budget))),
            cost_estimate=cost,
        )(*args)

    if n_pad != n_rows:
        out2d = out2d[:n_rows]
    return out2d.reshape(seq_len, batch, d_model)


# --------------------------------------------------------------------------------------
# Params / reference / self-test
# --------------------------------------------------------------------------------------
def init_params(key, d_model, d_inner, *, weight_dtype=jnp.bfloat16, dtype=jnp.float32):
    """Synthetic params. Weights stored transposed vs nn.Linear.weight, bf16 by default."""
    k1, k2, k3, k4 = jax.random.split(key, 4)
    w1 = (jax.random.normal(k1, (d_model, d_inner), jnp.float32) * 0.02).astype(weight_dtype)
    b1 = (jax.random.normal(k2, (1, d_inner), jnp.float32) * 0.02).astype(dtype)
    w2 = (jax.random.normal(k3, (d_inner, d_model), jnp.float32) * 0.02).astype(weight_dtype)
    b2 = (jax.random.normal(k4, (1, d_model), jnp.float32) * 0.02).astype(dtype)
    ln_g = jnp.ones((1, d_model), dtype)    # nn.LayerNorm default weight
    ln_b = jnp.zeros((1, d_model), dtype)   # nn.LayerNorm default bias
    return {"w1": w1, "b1": b1, "w2": w2, "b2": b2, "ln_g": ln_g, "ln_b": ln_b}


def reference(inp, params, *, pre_lnorm: bool = False):
    """Pure-JAX reference mirroring the PyTorch forward (eval mode) with the same
    mixed-precision recipe the kernel uses (MXU-dtype operands, f32 accumulation)."""
    d_model = inp.shape[-1]
    w_dtype = params["w1"].dtype
    ep = _select_epilogue_dtype(w_dtype)
    x = inp.reshape(-1, d_model).astype(jnp.float32)
    g = params["ln_g"].reshape(-1).astype(jnp.float32)
    b = params["ln_b"].reshape(-1).astype(jnp.float32)
    if pre_lnorm:
        x = _layer_norm(x, g, b)
    h = jnp.dot(x.astype(w_dtype), params["w1"], preferred_element_type=jnp.float32)
    h = h.astype(ep) + params["b1"].reshape(-1).astype(ep)
    h = jnp.maximum(h, 0.0)
    h = h * h
    y = jnp.dot(h.astype(params["w2"].dtype), params["w2"],
                preferred_element_type=jnp.float32) + params["b2"].reshape(-1).astype(jnp.float32)
    out = y + x                     # module adds residual to the (possibly normed) inp
    if not pre_lnorm:
        out = _layer_norm(out, g, b)
    return out.reshape(inp.shape).astype(inp.dtype)


if __name__ == "__main__":
    key = jax.random.PRNGKey(0)
    k_inp, k_par, k_par2 = jax.random.split(key, 3)

    seq_len, batch, d_model, d_inner = 8, 2, 32, 64
    inp = jax.random.normal(k_inp, (seq_len, batch, d_model), jnp.float32)
    params = init_params(k_par, d_model, d_inner)

    # post-lnorm (default) path
    out = jax.block_until_ready(positionwise_ff_primer_ez(inp, params, pre_lnorm=False))
    ref = reference(inp, params, pre_lnorm=False)
    assert out.shape == inp.shape
    assert jnp.allclose(out, ref, atol=2e-3, rtol=2e-3), "post-lnorm mismatch vs reference"

    # pre-lnorm path (residual uses the normalized input, exactly as the module does)
    out_pre = jax.block_until_ready(positionwise_ff_primer_ez(inp, params, pre_lnorm=True))
    ref_pre = reference(inp, params, pre_lnorm=True)
    assert jnp.allclose(out_pre, ref_pre, atol=2e-3, rtol=2e-3), "pre-lnorm mismatch vs reference"

    # Exercise the d_inner-tiled ("arbitrary" reduction axis + accumulator) path that large
    # FFNs take on v7x's 64 MiB VMEM, forced at a small shape with two K tiles.
    d_inner2 = 256
    params2 = init_params(k_par2, d_model, d_inner2)
    out_t = jax.block_until_ready(
        positionwise_ff_primer_ez(inp, params2, pre_lnorm=False,
                                  force_dinner_tiled=True, dinner_tile=128))
    ref_t = reference(inp, params2, pre_lnorm=False)
    assert jnp.allclose(out_t, ref_t, atol=2e-3, rtol=2e-3), "d_inner-tiled path mismatch"

    print("KERNEL_OK")
</pallas_src>

<mosaic_0001>
module attributes {stable_mosaic.version = 11 : i64} {
  func.func @_ffn_resident_kernel(%arg0: i32, %arg1: memref<16x32xf32, #tpu.memory_space<vmem>>, %arg2: memref<32x64xbf16, #tpu.memory_space<vmem>>, %arg3: memref<1x64xf32, #tpu.memory_space<vmem>>, %arg4: memref<64x32xbf16, #tpu.memory_space<vmem>>, %arg5: memref<1x32xf32, #tpu.memory_space<vmem>>, %arg6: memref<1x32xf32, #tpu.memory_space<vmem>>, %arg7: memref<1x32xf32, #tpu.memory_space<vmem>>, %arg8: memref<16x32xf32, #tpu.memory_space<vmem>>) attributes {dimension_semantics = [#tpu.dimension_semantics<parallel>], iteration_bounds = array<i64: 1>, scalar_prefetch = 0 : i64, scratch_operands = 0 : i64, tpu.core_type = #tpu.core_type<tc>, window_params = [{transform_indices = @transform_0, window_bounds = array<i64: 16, 32>}, {pipeline_mode = #tpu.pipeline_mode<synchronous>, transform_indices = @transform_1, window_bounds = array<i64: 32, 64>}, {pipeline_mode = #tpu.pipeline_mode<synchronous>, transform_indices = @transform_2, window_bounds = array<i64: 1, 64>}, {pipeline_mode = #tpu.pipeline_mode<synchronous>, transform_indices = @transform_3, window_bounds = array<i64: 64, 32>}, {pipeline_mode = #tpu.pipeline_mode<synchronous>, transform_indices = @transform_4, window_bounds = array<i64: 1, 32>}, {pipeline_mode = #tpu.pipeline_mode<synchronous>, transform_indices = @transform_5, window_bounds = array<i64: 1, 32>}, {pipeline_mode = #tpu.pipeline_mode<synchronous>, transform_indices = @transform_6, window_bounds = array<i64: 1, 32>}, {transform_indices = @transform_7, window_bounds = array<i64: 16, 32>}]} {
    %c0 = arith.constant 0 : index
    %c0_0 = arith.constant 0 : index
    %0 = vector.load %arg1[%c0, %c0_0] : memref<16x32xf32, #tpu.memory_space<vmem>>, vector<16x32xf32>
    %c0_1 = arith.constant 0 : index
    %c0_2 = arith.constant 0 : index
    %1 = vector.load %arg6[%c0_1, %c0_2] : memref<1x32xf32, #tpu.memory_space<vmem>>, vector<1x32xf32>
    %c0_3 = arith.constant 0 : index
    %c0_4 = arith.constant 0 : index
    %2 = vector.load %arg7[%c0_3, %c0_4] : memref<1x32xf32, #tpu.memory_space<vmem>>, vector<1x32xf32>
    %3 = arith.truncf %0 : vector<16x32xf32> to vector<16x32xbf16>
    %c0_5 = arith.constant 0 : index
    %c0_6 = arith.constant 0 : index
    %4 = vector.load %arg2[%c0_5, %c0_6] : memref<32x64xbf16, #tpu.memory_space<vmem>>, vector<32x64xbf16>
    %cst = arith.constant dense<0.000000e+00> : vector<16x64xf32>
    %5 = tpu.matmul %3, %4, %cst {dimension_numbers = #tpu.dot_dimension_numbers<[1], [0], [0], [1], [0, 0, 1, 1], [], []>} : vector<16x32xbf16>, vector<32x64xbf16>, vector<16x64xf32> -> vector<16x64xf32>
    %6 = arith.truncf %5 : vector<16x64xf32> to vector<16x64xbf16>
    %c0_7 = arith.constant 0 : index
    %c0_8 = arith.constant 0 : index
    %7 = vector.load %arg3[%c0_7, %c0_8] : memref<1x64xf32, #tpu.memory_space<vmem>>, vector<1x64xf32>
    %8 = arith.truncf %7 : vector<1x64xf32> to vector<1x64xbf16>
    %9 = vector.broadcast %8 : vector<1x64xbf16> to vector<16x64xbf16>
    %10 = arith.addf %6, %9 : vector<16x64xbf16>
    %cst_9 = arith.constant 0.000000e+00 : bf16
    %11 = vector.broadcast %cst_9 : bf16 to vector<16x64xbf16>
    %12 = arith.maximumf %10, %11 : vector<16x64xbf16>
    %13 = arith.mulf %12, %12 : vector<16x64xbf16>
    %c0_10 = arith.constant 0 : index
    %c0_11 = arith.constant 0 : index
    %14 = vector.load %arg4[%c0_10, %c0_11] : memref<64x32xbf16, #tpu.memory_space<vmem>>, vector<64x32xbf16>
    %cst_12 = arith.constant dense<0.000000e+00> : vector<16x32xf32>
    %15 = tpu.matmul %13, %14, %cst_12 {dimension_numbers = #tpu.dot_dimension_numbers<[1], [0], [0], [1], [0, 0, 1, 1], [], []>} : vector<16x64xbf16>, vector<64x32xbf16>, vector<16x32xf32> -> vector<16x32xf32>
    %c0_13 = arith.constant 0 : index
    %c0_14 = arith.constant 0 : index
    %16 = vector.load %arg5[%c0_13, %c0_14] : memref<1x32xf32, #tpu.memory_space<vmem>>, vector<1x32xf32>
    %17 = vector.broadcast %16 : vector<1x32xf32> to vector<16x32xf32>
    %18 = arith.addf %15, %17 : vector<16x32xf32>
    %19 = arith.addf %18, %0 : vector<16x32xf32>
    %cst_15 = arith.constant dense<0.000000e+00> : vector<16xf32>
    %20 = vector.multi_reduction <add>, %19, %cst_15 [1] : vector<16x32xf32> to vector<16xf32>
    %21 = vector.shape_cast %20 : vector<16xf32> to vector<16x1xf32>
    %cst_16 = arith.constant 3.200000e+01 : f32
    %22 = vector.broadcast %cst_16 : f32 to vector<16x1xf32>
    %23 = arith.divf %21, %22 : vector<16x1xf32>
    %24 = vector.broadcast %23 : vector<16x1xf32> to vector<16x32xf32>
    %25 = arith.subf %19, %24 : vector<16x32xf32>
    %26 = arith.mulf %25, %25 : vector<16x32xf32>
    %cst_17 = arith.constant dense<0.000000e+00> : vector<16xf32>
    %27 = vector.multi_reduction <add>, %26, %cst_17 [1] : vector<16x32xf32> to vector<16xf32>
    %28 = vector.shape_cast %27 : vector<16xf32> to vector<16x1xf32>
    %cst_18 = arith.constant 3.200000e+01 : f32
    %29 = vector.broadcast %cst_18 : f32 to vector<16x1xf32>
    %30 = arith.divf %28, %29 : vector<16x1xf32>
    %cst_19 = arith.constant 9.99999974E-6 : f32
    %31 = vector.broadcast %cst_19 : f32 to vector<16x1xf32>
    %32 = arith.addf %30, %31 : vector<16x1xf32>
    %33 = math.rsqrt %32 : vector<16x1xf32>
    %34 = vector.broadcast %33 : vector<16x1xf32> to vector<16x32xf32>
    %35 = arith.mulf %25, %34 : vector<16x32xf32>
    %36 = vector.broadcast %1 : vector<1x32xf32> to vector<16x32xf32>
    %37 = arith.mulf %35, %36 : vector<16x32xf32>
    %38 = vector.broadcast %2 : vector<1x32xf32> to vector<16x32xf32>
    %39 = arith.addf %37, %38 : vector<16x32xf32>
    %c0_20 = arith.constant 0 : index
    %c0_21 = arith.constant 0 : index
    %40 = vector.load %arg8[%c0_20, %c0_21] : memref<16x32xf32, #tpu.memory_space<vmem>>, vector<16x32xf32>
    tpu.vector_store %arg8[%c0_20, %c0_21], %39 {strides = array<i32>} : memref<16x32xf32, #tpu.memory_space<vmem>>, vector<16x32xf32>,
    return
  }
  func.func @transform_0(%arg0: i32) -> (i32, i32) {
    %c0_i32 = arith.constant 0 : i32
    %c0_i32_0 = arith.constant 0 : i32
    return %arg0, %c0_i32 : i32, i32
  }
  func.func @transform_1(%arg0: i32) -> (i32, i32) {
    %c0_i32 = arith.constant 0 : i32
    %c0_i32_0 = arith.constant 0 : i32
    %c0_i32_1 = arith.constant 0 : i32
    return %c0_i32, %c0_i32_0 : i32, i32
  }
  func.func @transform_2(%arg0: i32) -> (i32, i32) {
    %c0_i32 = arith.constant 0 : i32
    %c0_i32_0 = arith.constant 0 : i32
    %c0_i32_1 = arith.constant 0 : i32
    return %c0_i32, %c0_i32_0 : i32, i32
  }
  func.func @transform_3(%arg0: i32) -> (i32, i32) {
    %c0_i32 = arith.constant 0 : i32
    %c0_i32_0 = arith.constant 0 : i32
    %c0_i32_1 = arith.constant 0 : i32
    return %c0_i32, %c0_i32_0 : i32, i32
  }
  func.func @transform_4(%arg0: i32) -> (i32, i32) {
    %c0_i32 = arith.constant 0 : i32
    %c0_i32_0 = arith.constant 0 : i32
    %c0_i32_1 = arith.constant 0 : i32
    return %c0_i32, %c0_i32_0 : i32, i32
  }
  func.func @transform_5(%arg0: i32) -> (i32, i32) {
    %c0_i32 = arith.constant 0 : i32
    %c0_i32_0 = arith.constant 0 : i32
    %c0_i32_1 = arith.constant 0 : i32
    return %c0_i32, %c0_i32_0 : i32, i32
  }
  func.func @transform_6(%arg0: i32) -> (i32, i32) {
    %c0_i32 = arith.constant 0 : i32
    %c0_i32_0 = arith.constant 0 : i32
    %c0_i32_1 = arith.constant 0 : i32
    return %c0_i32, %c0_i32_0 : i32, i32
  }
  func.func @transform_7(%arg0: i32) -> (i32, i32) {
    %c0_i32 = arith.constant 0 : i32
    %c0_i32_0 = arith.constant 0 : i32
    return %arg0, %c0_i32 : i32, i32
  }
}

</mosaic_0001>

<bundles_post_ra>
// kernel: tpu_custom_call.1
= control target key start
LH: loop header
LB: loop body
LE: loop exit
PB: predicated region body
PF: predicated region fallthrough
CT: control target
= control target key end

     0   :  { %v333_v1 = vmov 0.0   ;;  %vm334_vm0 = vmmov 0   ;;  %s434_s0 = inlined_call_operand.vmem [shape: f32[16,32], index: 0, kind: input, shape index: {}]   ;;  %s435_s1 = inlined_call_operand.vmem [shape: bf16[32,64], index: 1, kind: input, shape index: {}]   ;;  %s436_s2 = inlined_call_operand.vmem [shape: f32[1,64], index: 2, kind: input, shape index: {}]   ;;  %s437_s3 = inlined_call_operand.vmem [shape: bf16[64,32], index: 3, kind: input, shape index: {}]   ;;  %s438_s4 = inlined_call_operand.vmem [shape: f32[1,32], index: 4, kind: input, shape index: {}]   ;;  %s439_s5 = inlined_call_operand.vmem [shape: f32[1,32], index: 5, kind: input, shape index: {}]   ;;  %s440_s6 = inlined_call_operand.vmem [shape: f32[1,32], index: 6, kind: input, shape index: {}]   ;;  %s441_s7 = inlined_call_operand.hbm [shape: f32[16,32], index: 7, kind: output, shape index: {}]  }
   0x1   :  { %v299_v0 = vld [vmem:[%s435_s1] sm:$0xff]   ;;  %273 = vmatprep.subr.bf16.mxu0 %v333_v1  ;;  %v300_v2 = vld [vmem:[%s435_s1 + $0x8] sm:$0xff]   ;;  %281 = vmatprep.subr.bf16.mxu1 %v333_v1 }
   0x2   :  { %274 = vmatpush3.bf16.msra.mxu0 %v299_v0  ;;  %277 = vmatprep.mubr.msk.bf16.mxu0 %vm334_vm0, %v333_v1  ;;  %v28_v3 = vld [vmem:[%s434_s0] sm:$0xff]  ;;  %v29_v4 = vld [vmem:[%s434_s0 + $0x8] sm:$0xff] }
   0x3   :  { %275 = vmatprep.subr.bf16.mxu0 %v333_v1  ;;  %v301_v5 = vld [vmem:[%s437_s3] sm:$0xff]   ;;  %289 = vmatprep.mubr.msk.bf16.mxu1 %vm334_vm0, %v333_v1  ;;  %v32_v6 = vpack.c.bf16 %v29_v4, %v28_v3 }
   0x4   :  { %282 = vmatpush3.bf16.msra.mxu1 %v301_v5 }
   0x5   :  { %12 = vsyncpa [#allocation3], 0  ;;  %vm49_vm1 = vcmask 261120   ;;  %283 = vmatprep.subr.bf16.mxu1 %v333_v1  ;;  %v302_v7 = vld [vmem:[%s437_s3 + $0x8] sm:$0xff]   ;;  %v303_v8 = vld [vmem:[%s437_s3 + $0x10] sm:$0xff]   ;;  %v100_v10 = vlaneseq  ;;  %v335_v23 = vmov 0  }
   0x6   :  { %276 = vmatpush3.bf16.msra.mxu0 %v300_v2  ;;  %v304_v9 = vld [vmem:[%s437_s3 + $0x18] sm:$0xff]   ;;  %v95_v11 = vld [vmem:[%s436_s2] sm:$0x1]  ;;  %vm146_vm2 = vcmask 523264   ;;  %s336_s20 = smov [#allocation2]  }
   0x7   :  { %v96_v12 = vpack.c.bf16 %v95_v11, %v95_v11  ;;  %v101_v13 = vshrl.u32 %v100_v10, 7  ;;  %v257_v26 = vld [vmem:[%s438_s4] ss:$0 sm:$0xff]  ;;  %s243_s21 = sshll.u32 %s336_s20, 4  ;;  %s244_s21 = int_to_ptr.vmem [resolvable:$true] %s243_s21 }
   0x8   :  { %284 = vmatpush3.bf16.msra.mxu1 %v302_v7  ;;  %v263_v54 = vld [vmem:[%s439_s5] ss:$0 sm:$0xff]  ;;  %s309_s22 = scalar_lea.vmem %s244_s21, 256  ;;  %p314_p1 = scmp.lt.s32.totalorder %s244_s21, %s244_s21 }
   0x9   :  { %278 = vmatmul.mubr.msk.bf16.vlgmr.msra.gmra.mrb[0].mxu0 %vm49_vm1, %v32_v6  ;;  %285 = vmatprep.subr.bf16.mxu1 %v333_v1  ;;  %v98_v14 = vpack.i.b16 %v96_v12, %v96_v12  ;;  %v102_v15 = vsub.s32 0, %v101_v13  ;;  %v264_v56 = vld [vmem:[%s440_s6] ss:$0 sm:$0xff]  ;;  %p310_p0 = scmp.ne.s32.totalorder %s244_s21, %s309_s22  ;;  %p315_p2 = scmp.lt.s32.totalorder %s309_s22, %s309_s22 }
   0xb   :  { %v103_v18 = vrot.slane %v98_v14, %v102_v15  ;;  %p316_p3 = por %p315_p2, %p314_p1 }
   0xc   :  { %286 = vmatpush3.bf16.msra.mxu1 %v303_v8 }
   0xd   :  { %287 = vmatprep.subr.bf16.mxu1 %v333_v1  ;;  %p317_p4 = pnand %p316_p3, %p310_p0 }
  0x10   :  { %288 = vmatpush3.bf16.msra.mxu1 %v304_v9 }
  0xdc   :  { %v87_v16 = vpop.f32.mrb[0].mxu0 }
  0xdd   :  { %v279_v17 = vpop.f32.mrb[1].mxu0 }
  0xde   :  { %v90_v19 = vpop.f32.mrb[2].mxu0 }
  0xdf   :  { %v94_v20 = vpack.c.bf16 %v90_v19, %v87_v16  ;;  %v280_v21 = vpop.f32.mrb[3].mxu0 }
  0xe1   :  { %v104_v22 = vadd.bf16 %v103_v18, %v94_v20 }
  0xe3   :  { %v105_v24 = vmax.bf16 %v335_v23, %v104_v22 }
  0xe5   :  { %v106_v25 = vmul.bf16 %v105_v24, %v105_v24 }
  0xe7   :  { %290 = vmatmul.mubr.msk.bf16.vlgmr.msra.gmra.mrb[0].mxu1 %vm146_vm2, %v106_v25 }
 0x1ba   :  { %v184_v27 = vpop.f32.mrb[0].mxu1 }
 0x1bb   :  { %v185_v28 = vadd.f32 %v257_v26, %v184_v27  ;;  %v291_v29 = vpop.f32.mrb[1].mxu1 }
 0x1bc   :  { %v187_v30 = vpop.f32.mrb[2].mxu1 }
 0x1bd   :  { %v188_v31 = vadd.f32 %v257_v26, %v187_v30  ;;  %v292_v32 = vpop.f32.mrb[3].mxu1  ;;  %v191_v33 = vadd.f32 %v185_v28, %v28_v3 }
 0x1bf   :  { %v193_v34 = vsel %vm49_vm1, %v191_v33, 0.0  ;;  %v192_v35 = vadd.f32 %v188_v31, %v29_v4 }
 0x1c0   :  { %194 = vadd.xlane.f32.xlu0 %v193_v34 }
 0x1c1   :  { %v196_v36 = vsel %vm49_vm1, %v192_v35, 0.0 }
 0x1c4   :  { %197 = vadd.xlane.f32.xlu0 %v196_v36 }
 0x24d   :  { %v195_v37 = vpop.xlane.xlu0 %194 }
 0x24e   :  { %v200_v38 = vmul.f32 0.03125, %v195_v37 }
 0x250   :  { %v202_v39 = vsub.f32 %v191_v33, %v200_v38 }
 0x251   :  { %v198_v40 = vpop.xlane.xlu0 %197 }
 0x252   :  { %v201_v41 = vmul.f32 0.03125, %v198_v40  ;;  %v204_v42 = vmul.f32 %v202_v39, %v202_v39 }
 0x254   :  { %v203_v43 = vsub.f32 %v192_v35, %v201_v41  ;;  %v206_v44 = vsel %vm49_vm1, %v204_v42, 0.0 }
 0x255   :  { %207 = vadd.xlane.f32.xlu1 %v206_v44 }
 0x256   :  { %v205_v45 = vmul.f32 %v203_v43, %v203_v43 }
 0x258   :  { %v209_v46 = vsel %vm49_vm1, %v205_v45, 0.0 }
 0x259   :  { %210 = vadd.xlane.f32.xlu1 %v209_v46 }
 0x2e2   :  { %v208_v47 = vpop.xlane.xlu1 %207 }
 0x2e3   :  { %v212_v48 = vmul.f32 0.03125, %v208_v47 }
 0x2e5   :  { %v214_v49 = vadd.f32 1e-05, %v212_v48 }
 0x2e6   :  { %v211_v50 = vpop.xlane.xlu1 %210 }
 0x2e7   :  { %305 = vrsqrt.f32 %v214_v49  ;;  %v213_v51 = vmul.f32 0.03125, %v211_v50 }
 0x2e9   :  { %v215_v52 = vadd.f32 1e-05, %v213_v51 }
 0x2eb   :  { %307 = vrsqrt.f32 %v215_v52 }
 0x2f1   :  { %v306_v53 = vpop.eup %305 }
 0x2f2   :  { %v218_v55 = vmul.f32 %v306_v53, %v202_v39 }
 0x2f4   :  { %v226_v57 = vmul.f32 %v263_v54, %v218_v55 }
 0x2f5   :  { %v308_v58 = vpop.eup %307 }
 0x2f6   :  { %v219_v59 = vmul.f32 %v308_v58, %v203_v43  ;;  %v234_v60 = vadd.f32 %v264_v56, %v226_v57 }
 0x2f8   :  { %v227_v61 = vmul.f32 %v263_v54, %v219_v59  ;;  %236 = vst.msk [vmem:[#allocation2] sm:$0xff] %vm49_vm1, %v234_v60 }
 0x2fa   :  { %v235_v62 = vadd.f32 %v264_v56, %v227_v61 }
 0x2fc   :  { %237 = vst.msk [vmem:[#allocation2 + $0x8] sm:$0xff] %vm49_vm1, %v235_v62 }
 0x2fd   :  { %320 = shalt.err (!%p317_p4)
}
 0x2fe   :  { %s321_s23 = scalar_lea.hbm %s441_s7, 256 }
 0x2ff   :  { %p322_p5 = scmp.ne.s32.totalorder %s441_s7, %s321_s23  ;;  %p325_p6 = scmp.lt.u32.totalorder %s321_s23, %s441_s7 }
 0x301   :  { %p327_p7 = pnand %p325_p6, %p322_p5 }
 0x303   :  { %330 = shalt.err (!%p327_p7)
}
 0x304   :  { %s337_s28 = smov 128   ;;  %s338_s29 = smov 8  }
 0x305   :  { %249 = dma.vmem_to_hbm [thread:$0]  %s244_s21, 256, %s441_s7, [#allocation3], %s337_s28, %s337_s28, %s338_s29  }
 0x306   :  { %331 = dma.done.wait [#allocation3], 256  }
 0x307   :  { %332 = vsyncadd [#allocation3], 4294967040 }
 0x308   :  { %253 = vsyncpa [#allocation3], 1 }

</bundles_post_ra>
